<compile_context>
chip_gen: v7x
topology: tpu7x:2x2x1
jax: 0.10.0
libtpu: 0.0.40
codegen_flags: <defaults>
</compile_context>

<pallas_src>
import math
import functools

import jax
import jax.numpy as jnp
from jax.experimental import pallas as pl
from jax.experimental.pallas import tpu as pltpu


def _round_up(x, m):
    return x if x % m == 0 else x + (m - x % m)


def _vmem_budget_bytes():
    """Per-TensorCore VMEM budget with ~22% headroom for compiler scratch.

    ~100 MiB on 128-MiB parts (v5e/v6e), ~50 MiB on v7x's 64-MiB per-core VMEM.
    """
    cap = None
    try:
        cap = int(pltpu.get_tpu_info().vmem_capacity_bytes)
    except Exception:
        cap = None
    if not cap or cap <= 0:
        cap = 64 << 20  # conservative default == v7x per-core capacity
    return int(cap * 0.78)


def _pick_batch_tile(B, row_bytes, avail_bytes, max_block_b):
    """Choose the batch tile from the VMEM left after resident weights."""
    if B <= 8:
        return B
    cap = (B // 8) * 8 if B % 8 else B          # largest multiple of 8 <= B
    tb = max(8, min(int(avail_bytes // max(row_bytes, 1)), 4096, cap))
    if max_block_b is not None:
        tb = max(8, min(tb, int(max_block_b)))
    tb = (tb // 8) * 8
    # Prefer >= 2 pipeline steps (and an even grid for megacore) when B allows.
    if B >= 64 and tb * 2 > B:
        tb = max(8, (_round_up(pl.cdiv(B, 2), 8) // 8) * 8)
    # Align big tiles to the 256-wide MXU feed on v6e/v7x (128 suffices on v5e).
    if tb >= 512:
        tb = (tb // 256) * 256
    return max(8, tb)


def _two_layer_fc_kernel(x_ref, w1_ref, b1_ref, w2_ref, b2_ref, o_ref,
                         *, scale1, scale2):
    """One batch tile of: ((x @ W1^T)*s1 + b1*lr) @ W2^T * s2 + b2*lr.

    Weights arrive pre-transposed to (K, N), so both matmuls are plain
    (M,K)x(K,N) MXU feeds (no in-kernel relayout).  EqualLinear scales are
    applied to the matmul outputs (scalar scale commutes through the dot);
    biases already include lr_mul and stay f32.
    """
    x = x_ref[...].astype(w1_ref.dtype)          # cast to compute dtype in-kernel

    h = jnp.dot(x, w1_ref[...], preferred_element_type=jnp.float32)
    h = h * scale1 + b1_ref[...]                 # f32 scale/bias

    out = jnp.dot(h.astype(w2_ref.dtype), w2_ref[...],
                  preferred_element_type=jnp.float32)
    out = out * scale2 + b2_ref[...]

    o_ref[...] = out.astype(o_ref.dtype)


def prepare_two_layer_fc_params(w1, b1, w2, b2, *, lr_mul=1.0,
                                compute_dtype=jnp.bfloat16):
    """One-time parameter preprocessing (hoisted out of the per-call path).

    w1 : (mid, in_dim)  PyTorch (out, in) layout   b1 : (mid,)
    w2 : (out_dim, mid)                            b2 : (out_dim,)
    Returns transposed/cast/padded params ready for `two_layer_fc_apply`.
    """
    mid, in_dim = w1.shape
    out_dim, mid2 = w2.shape
    assert mid2 == mid, "w2 second dim must equal w1 first dim"

    scale1 = (1.0 / math.sqrt(in_dim)) * lr_mul if in_dim > 0 else lr_mul
    scale2 = (1.0 / math.sqrt(mid)) * lr_mul if mid > 0 else lr_mul

    out_p = _round_up(out_dim, 128)              # lane-dense output slab

    w1t = jnp.asarray(w1).T.astype(compute_dtype)            # (in_dim, mid)
    w2t = jnp.asarray(w2).T.astype(compute_dtype)            # (mid, out_dim)
    b1r = (jnp.asarray(b1, jnp.float32) * lr_mul).reshape(1, mid)
    b2r = (jnp.asarray(b2, jnp.float32) * lr_mul).reshape(1, out_dim)
    if out_p != out_dim:
        w2t = jnp.pad(w2t, ((0, 0), (0, out_p - out_dim)))
        b2r = jnp.pad(b2r, ((0, 0), (0, out_p - out_dim)))

    return dict(w1t=w1t, b1r=b1r, w2t=w2t, b2r=b2r,
                scale1=scale1, scale2=scale2,
                in_dim=in_dim, mid=mid, out_dim=out_dim, out_p=out_p)


def two_layer_fc_apply(x, params, *, max_block_b=None, return_padded=False):
    """Forward pass of TwoLayerFC (activation=None) on pre-prepared params."""
    B, in_dim = x.shape
    assert in_dim == params["in_dim"]
    mid, out_dim, out_p = params["mid"], params["out_dim"], params["out_p"]
    w1t, b1r, w2t, b2r = params["w1t"], params["b1r"], params["w2t"], params["b2r"]
    out_dtype = x.dtype

    x_isz = jnp.dtype(x.dtype).itemsize
    w_isz = jnp.dtype(w1t.dtype).itemsize
    o_isz = jnp.dtype(out_dtype).itemsize

    vmem_budget = _vmem_budget_bytes()
    # Resident weights/biases; budgeted at 2x in case single-buffering
    # (pl.Buffered(1)) is unavailable and Pallas double-buffers them anyway.
    resident_bytes = 2 * ((w1t.size + w2t.size) * w_isz
                          + (b1r.size + b2r.size) * 4)
    # Per-batch-row VMEM: double-buffered x and out tiles + f32 intermediates.
    row_bytes = 2 * in_dim * x_isz + 2 * out_p * o_isz + 4 * (mid + out_p)

    if resident_bytes + 8 * row_bytes + (8 << 20) > vmem_budget:
        # TODO(synk): add a weight-tiled fallback (grid over mid / in_dim with an
        # f32 accumulator scratch, reduction axis "arbitrary") for layers whose
        # weights cannot stay VMEM-resident (mainly relevant on v7x's 64 MiB).
        raise ValueError("TwoLayerFC weights too large to stay VMEM-resident")

    tb = _pick_batch_tile(B, row_bytes,
                          vmem_budget - resident_bytes - (8 << 20), max_block_b)
    grid = (pl.cdiv(B, tb),)

    vmem_limit = int(max(16 << 20,
                         min(vmem_budget,
                             resident_bytes + tb * row_bytes + (8 << 20))))

    flops = 2 * B * (in_dim * mid + mid * out_p)
    bytes_accessed = (x.size * x_isz + (w1t.size + w2t.size) * w_isz
                      + (b1r.size + b2r.size) * 4 + B * out_p * o_isz)

    kernel = functools.partial(_two_layer_fc_kernel,
                               scale1=params["scale1"], scale2=params["scale2"])

    def run(single_buffer_weights):
        res_kw = ({"pipeline_mode": pl.Buffered(1)}
                  if single_buffer_weights else {})
        in_specs = [
            pl.BlockSpec((tb, in_dim), lambda i: (i, 0)),             # x: pipelined
            pl.BlockSpec((in_dim, mid), lambda i: (0, 0), **res_kw),  # W1^T resident
            pl.BlockSpec((1, mid), lambda i: (0, 0), **res_kw),       # b1*lr resident
            pl.BlockSpec((mid, out_p), lambda i: (0, 0), **res_kw),   # W2^T resident
            pl.BlockSpec((1, out_p), lambda i: (0, 0), **res_kw),     # b2*lr resident
        ]
        return pl.pallas_call(
            kernel,
            out_shape=jax.ShapeDtypeStruct((B, out_p), out_dtype),
            grid=grid,
            in_specs=in_specs,
            out_specs=pl.BlockSpec((tb, out_p), lambda i: (i, 0)),
            compiler_params=pltpu.CompilerParams(
                dimension_semantics=("parallel",),
                vmem_limit_bytes=vmem_limit),
            cost_estimate=pl.CostEstimate(
                flops=flops, transcendentals=0, bytes_accessed=bytes_accessed),
        )(x, w1t, b1r, w2t, b2r)

    try:
        out_padded = run(True)       # single-buffered resident weights
    except Exception:
        out_padded = run(False)      # fallback: default (double) buffering

    if return_padded or out_p == out_dim:
        return out_padded
    return out_padded[:, :out_dim]


def two_layer_fc(x, w1, b1, w2, b2, *, lr_mul=1.0,
                 compute_dtype=jnp.bfloat16, max_block_b=None):
    """Convenience wrapper: prepares params and applies (prefer hoisting
    prepare_two_layer_fc_params out of hot loops)."""
    params = prepare_two_layer_fc_params(w1, b1, w2, b2, lr_mul=lr_mul,
                                         compute_dtype=compute_dtype)
    return two_layer_fc_apply(x, params, max_block_b=max_block_b)


def two_layer_fc_ref(x, w1, b1, w2, b2, *, lr_mul=1.0):
    """Pure-JAX reference mirroring the PyTorch module (activation=None)."""
    in_dim = x.shape[1]
    mid = w1.shape[0]
    s1 = (1.0 / math.sqrt(in_dim)) * lr_mul if in_dim > 0 else lr_mul
    s2 = (1.0 / math.sqrt(mid)) * lr_mul if mid > 0 else lr_mul
    h = x @ (w1 * s1).T + b1 * lr_mul
    return h @ (w2 * s2).T + b2 * lr_mul


if __name__ == "__main__":
    bias_init = 0.0
    lr_mul = 1.0
    key = jax.random.PRNGKey(0)

    # Module's nominal small shapes: batch=2, in_dim=32, middle_dim=64, out_dim=32.
    B, in_dim, mid, out_dim = 2, 32, 64, 32
    kx, kw1, kw2, key = jax.random.split(key, 4)
    x = jax.random.normal(kx, (B, in_dim), dtype=jnp.float32)
    # EqualLinear init: weight = randn(out, in) / lr_mul ; bias = bias_init.
    w1 = jax.random.normal(kw1, (mid, in_dim), dtype=jnp.float32) / lr_mul
    b1 = jnp.full((mid,), bias_init, dtype=jnp.float32)
    w2 = jax.random.normal(kw2, (out_dim, mid), dtype=jnp.float32) / lr_mul
    b2 = jnp.full((out_dim,), bias_init, dtype=jnp.float32)

    ref = two_layer_fc_ref(x, w1, b1, w2, b2, lr_mul=lr_mul)

    # --- Test 1: default bf16 compute path (MXU fast path, f32 accumulation).
    params_bf16 = prepare_two_layer_fc_params(w1, b1, w2, b2, lr_mul=lr_mul)
    out = jax.block_until_ready(two_layer_fc_apply(x, params_bf16))
    assert out.shape == (B, out_dim)
    assert out.dtype == x.dtype
    assert jnp.allclose(out, ref, atol=5e-2, rtol=5e-2), "mismatch (bf16 small)"

    # --- Test 2: f32 compute path, tight tolerance.
    params_f32 = prepare_two_layer_fc_params(w1, b1, w2, b2, lr_mul=lr_mul,
                                             compute_dtype=jnp.float32)
    out32 = jax.block_until_ready(two_layer_fc_apply(x, params_f32))
    assert jnp.allclose(out32, ref, atol=1e-4, rtol=1e-4), "mismatch (f32 small)"

    # --- Test 3: batch-gridded path (auto tile -> >=2 pipeline steps,
    #             weights resident across the whole grid), f32.
    B2 = 1024
    kx2, key = jax.random.split(key)
    x2 = jax.random.normal(kx2, (B2, in_dim), dtype=jnp.float32)
    ref2 = two_layer_fc_ref(x2, w1, b1, w2, b2, lr_mul=lr_mul)
    out2 = jax.block_until_ready(two_layer_fc_apply(x2, params_f32))
    assert out2.shape == (B2, out_dim)
    assert jnp.allclose(out2, ref2, atol=1e-4, rtol=1e-4), "mismatch (f32 gridded)"

    # --- Test 4: many grid steps via an explicit tile cap, bf16 default.
    out3 = jax.block_until_ready(
        two_layer_fc_apply(x2, params_bf16, max_block_b=128))
    assert jnp.allclose(out3, ref2, atol=5e-2, rtol=5e-2), "mismatch (bf16 gridded)"

    print("KERNEL_OK")
</pallas_src>

<mosaic_0001>
module attributes {stable_mosaic.version = 11 : i64} {
  func.func @_two_layer_fc_kernel(%arg0: i32, %arg1: memref<2x32xf32, #tpu.memory_space<vmem>>, %arg2: memref<32x64xbf16, #tpu.memory_space<vmem>>, %arg3: memref<1x64xf32, #tpu.memory_space<vmem>>, %arg4: memref<64x128xbf16, #tpu.memory_space<vmem>>, %arg5: memref<1x128xf32, #tpu.memory_space<vmem>>, %arg6: memref<2x128xf32, #tpu.memory_space<vmem>>) attributes {dimension_semantics = [#tpu.dimension_semantics<parallel>], iteration_bounds = array<i64: 1>, scalar_prefetch = 0 : i64, scratch_operands = 0 : i64, tpu.core_type = #tpu.core_type<tc>, window_params = [{transform_indices = @transform_0, window_bounds = array<i64: 2, 32>}, {pipeline_mode = #tpu.pipeline_mode<synchronous>, transform_indices = @transform_1, window_bounds = array<i64: 32, 64>}, {pipeline_mode = #tpu.pipeline_mode<synchronous>, transform_indices = @transform_2, window_bounds = array<i64: 1, 64>}, {pipeline_mode = #tpu.pipeline_mode<synchronous>, transform_indices = @transform_3, window_bounds = array<i64: 64, 128>}, {pipeline_mode = #tpu.pipeline_mode<synchronous>, transform_indices = @transform_4, window_bounds = array<i64: 1, 128>}, {transform_indices = @transform_5, window_bounds = array<i64: 2, 128>}]} {
    %c0 = arith.constant 0 : index
    %c0_0 = arith.constant 0 : index
    %0 = vector.load %arg1[%c0, %c0_0] : memref<2x32xf32, #tpu.memory_space<vmem>>, vector<2x32xf32>
    %1 = arith.truncf %0 : vector<2x32xf32> to vector<2x32xbf16>
    %c0_1 = arith.constant 0 : index
    %c0_2 = arith.constant 0 : index
    %2 = vector.load %arg2[%c0_1, %c0_2] : memref<32x64xbf16, #tpu.memory_space<vmem>>, vector<32x64xbf16>
    %cst = arith.constant dense<0.000000e+00> : vector<2x64xf32>
    %3 = tpu.matmul %1, %2, %cst {dimension_numbers = #tpu.dot_dimension_numbers<[1], [0], [0], [1], [0, 0, 1, 1], [], []>} : vector<2x32xbf16>, vector<32x64xbf16>, vector<2x64xf32> -> vector<2x64xf32>
    %cst_3 = arith.constant 0.176776692 : f32
    %4 = vector.broadcast %cst_3 : f32 to vector<2x64xf32>
    %5 = arith.mulf %3, %4 : vector<2x64xf32>
    %c0_4 = arith.constant 0 : index
    %c0_5 = arith.constant 0 : index
    %6 = vector.load %arg3[%c0_4, %c0_5] : memref<1x64xf32, #tpu.memory_space<vmem>>, vector<1x64xf32>
    %7 = vector.broadcast %6 : vector<1x64xf32> to vector<2x64xf32>
    %8 = arith.addf %5, %7 : vector<2x64xf32>
    %9 = arith.truncf %8 : vector<2x64xf32> to vector<2x64xbf16>
    %c0_6 = arith.constant 0 : index
    %c0_7 = arith.constant 0 : index
    %10 = vector.load %arg4[%c0_6, %c0_7] : memref<64x128xbf16, #tpu.memory_space<vmem>>, vector<64x128xbf16>
    %cst_8 = arith.constant dense<0.000000e+00> : vector<2x128xf32>
    %11 = tpu.matmul %9, %10, %cst_8 {dimension_numbers = #tpu.dot_dimension_numbers<[1], [0], [0], [1], [0, 0, 1, 1], [], []>} : vector<2x64xbf16>, vector<64x128xbf16>, vector<2x128xf32> -> vector<2x128xf32>
    %cst_9 = arith.constant 1.250000e-01 : f32
    %12 = vector.broadcast %cst_9 : f32 to vector<2x128xf32>
    %13 = arith.mulf %11, %12 : vector<2x128xf32>
    %c0_10 = arith.constant 0 : index
    %c0_11 = arith.constant 0 : index
    %14 = vector.load %arg5[%c0_10, %c0_11] : memref<1x128xf32, #tpu.memory_space<vmem>>, vector<1x128xf32>
    %15 = vector.broadcast %14 : vector<1x128xf32> to vector<2x128xf32>
    %16 = arith.addf %13, %15 : vector<2x128xf32>
    %c0_12 = arith.constant 0 : index
    %c0_13 = arith.constant 0 : index
    %17 = vector.load %arg6[%c0_12, %c0_13] : memref<2x128xf32, #tpu.memory_space<vmem>>, vector<2x128xf32>
    tpu.vector_store %arg6[%c0_12, %c0_13], %16 {strides = array<i32>} : memref<2x128xf32, #tpu.memory_space<vmem>>, vector<2x128xf32>,
    return
  }
  func.func @transform_0(%arg0: i32) -> (i32, i32) {
    %c0_i32 = arith.constant 0 : i32
    %c0_i32_0 = arith.constant 0 : i32
    return %arg0, %c0_i32 : i32, i32
  }
  func.func @transform_1(%arg0: i32) -> (i32, i32) {
    %c0_i32 = arith.constant 0 : i32
    %c0_i32_0 = arith.constant 0 : i32
    %c0_i32_1 = arith.constant 0 : i32
    return %c0_i32, %c0_i32_0 : i32, i32
  }
  func.func @transform_2(%arg0: i32) -> (i32, i32) {
    %c0_i32 = arith.constant 0 : i32
    %c0_i32_0 = arith.constant 0 : i32
    %c0_i32_1 = arith.constant 0 : i32
    return %c0_i32, %c0_i32_0 : i32, i32
  }
  func.func @transform_3(%arg0: i32) -> (i32, i32) {
    %c0_i32 = arith.constant 0 : i32
    %c0_i32_0 = arith.constant 0 : i32
    %c0_i32_1 = arith.constant 0 : i32
    return %c0_i32, %c0_i32_0 : i32, i32
  }
  func.func @transform_4(%arg0: i32) -> (i32, i32) {
    %c0_i32 = arith.constant 0 : i32
    %c0_i32_0 = arith.constant 0 : i32
    %c0_i32_1 = arith.constant 0 : i32
    return %c0_i32, %c0_i32_0 : i32, i32
  }
  func.func @transform_5(%arg0: i32) -> (i32, i32) {
    %c0_i32 = arith.constant 0 : i32
    %c0_i32_0 = arith.constant 0 : i32
    return %arg0, %c0_i32 : i32, i32
  }
}

module attributes {stable_mosaic.version = 11 : i64} {
  func.func @_two_layer_fc_kernel(%arg0: i32, %arg1: memref<2x32xf32, #tpu.memory_space<vmem>>, %arg2: memref<32x64xbf16, #tpu.memory_space<vmem>>, %arg3: memref<1x64xf32, #tpu.memory_space<vmem>>, %arg4: memref<64x128xbf16, #tpu.memory_space<vmem>>, %arg5: memref<1x128xf32, #tpu.memory_space<vmem>>, %arg6: memref<2x128xf32, #tpu.memory_space<vmem>>) attributes {dimension_semantics = [#tpu.dimension_semantics<parallel>], iteration_bounds = array<i64: 1>, scalar_prefetch = 0 : i64, scratch_operands = 0 : i64, tpu.core_type = #tpu.core_type<tc>, window_params = [{transform_indices = @transform_0, window_bounds = array<i64: 2, 32>}, {pipeline_mode = #tpu.pipeline_mode<synchronous>, transform_indices = @transform_1, window_bounds = array<i64: 32, 64>}, {pipeline_mode = #tpu.pipeline_mode<synchronous>, transform_indices = @transform_2, window_bounds = array<i64: 1, 64>}, {pipeline_mode = #tpu.pipeline_mode<synchronous>, transform_indices = @transform_3, window_bounds = array<i64: 64, 128>}, {pipeline_mode = #tpu.pipeline_mode<synchronous>, transform_indices = @transform_4, window_bounds = array<i64: 1, 128>}, {transform_indices = @transform_5, window_bounds = array<i64: 2, 128>}]} {
    %c0 = arith.constant 0 : index
    %c0_0 = arith.constant 0 : index
    %0 = vector.load %arg1[%c0, %c0_0] : memref<2x32xf32, #tpu.memory_space<vmem>>, vector<2x32xf32>
    %1 = arith.truncf %0 : vector<2x32xf32> to vector<2x32xbf16>
    %c0_1 = arith.constant 0 : index
    %c0_2 = arith.constant 0 : index
    %2 = vector.load %arg2[%c0_1, %c0_2] : memref<32x64xbf16, #tpu.memory_space<vmem>>, vector<32x64xbf16>
    %cst = arith.constant dense<0.000000e+00> : vector<2x64xf32>
    %3 = tpu.matmul %1, %2, %cst {dimension_numbers = #tpu.dot_dimension_numbers<[1], [0], [0], [1], [0, 0, 1, 1], [], []>} : vector<2x32xbf16>, vector<32x64xbf16>, vector<2x64xf32> -> vector<2x64xf32>
    %cst_3 = arith.constant 0.176776692 : f32
    %4 = vector.broadcast %cst_3 : f32 to vector<2x64xf32>
    %5 = arith.mulf %3, %4 : vector<2x64xf32>
    %c0_4 = arith.constant 0 : index
    %c0_5 = arith.constant 0 : index
    %6 = vector.load %arg3[%c0_4, %c0_5] : memref<1x64xf32, #tpu.memory_space<vmem>>, vector<1x64xf32>
    %7 = vector.broadcast %6 : vector<1x64xf32> to vector<2x64xf32>
    %8 = arith.addf %5, %7 : vector<2x64xf32>
    %9 = arith.truncf %8 : vector<2x64xf32> to vector<2x64xbf16>
    %c0_6 = arith.constant 0 : index
    %c0_7 = arith.constant 0 : index
    %10 = vector.load %arg4[%c0_6, %c0_7] : memref<64x128xbf16, #tpu.memory_space<vmem>>, vector<64x128xbf16>
    %cst_8 = arith.constant dense<0.000000e+00> : vector<2x128xf32>
    %11 = tpu.matmul %9, %10, %cst_8 {dimension_numbers = #tpu.dot_dimension_numbers<[1], [0], [0], [1], [0, 0, 1, 1], [], []>} : vector<2x64xbf16>, vector<64x128xbf16>, vector<2x128xf32> -> vector<2x128xf32>
    %cst_9 = arith.constant 1.250000e-01 : f32
    %12 = vector.broadcast %cst_9 : f32 to vector<2x128xf32>
    %13 = arith.mulf %11, %12 : vector<2x128xf32>
    %c0_10 = arith.constant 0 : index
    %c0_11 = arith.constant 0 : index
    %14 = vector.load %arg5[%c0_10, %c0_11] : memref<1x128xf32, #tpu.memory_space<vmem>>, vector<1x128xf32>
    %15 = vector.broadcast %14 : vector<1x128xf32> to vector<2x128xf32>
    %16 = arith.addf %13, %15 : vector<2x128xf32>
    %c0_12 = arith.constant 0 : index
    %c0_13 = arith.constant 0 : index
    %17 = vector.load %arg6[%c0_12, %c0_13] : memref<2x128xf32, #tpu.memory_space<vmem>>, vector<2x128xf32>
    tpu.vector_store %arg6[%c0_12, %c0_13], %16 {strides = array<i32>} : memref<2x128xf32, #tpu.memory_space<vmem>>, vector<2x128xf32>,
    return
  }
  func.func @transform_0(%arg0: i32) -> (i32, i32) {
    %c0_i32 = arith.constant 0 : i32
    %c0_i32_0 = arith.constant 0 : i32
    return %arg0, %c0_i32 : i32, i32
  }
  func.func @transform_1(%arg0: i32) -> (i32, i32) {
    %c0_i32 = arith.constant 0 : i32
    %c0_i32_0 = arith.constant 0 : i32
    %c0_i32_1 = arith.constant 0 : i32
    return %c0_i32, %c0_i32_0 : i32, i32
  }
  func.func @transform_2(%arg0: i32) -> (i32, i32) {
    %c0_i32 = arith.constant 0 : i32
    %c0_i32_0 = arith.constant 0 : i32
    %c0_i32_1 = arith.constant 0 : i32
    return %c0_i32, %c0_i32_0 : i32, i32
  }
  func.func @transform_3(%arg0: i32) -> (i32, i32) {
    %c0_i32 = arith.constant 0 : i32
    %c0_i32_0 = arith.constant 0 : i32
    %c0_i32_1 = arith.constant 0 : i32
    return %c0_i32, %c0_i32_0 : i32, i32
  }
  func.func @transform_4(%arg0: i32) -> (i32, i32) {
    %c0_i32 = arith.constant 0 : i32
    %c0_i32_0 = arith.constant 0 : i32
    %c0_i32_1 = arith.constant 0 : i32
    return %c0_i32, %c0_i32_0 : i32, i32
  }
  func.func @transform_5(%arg0: i32) -> (i32, i32) {
    %c0_i32 = arith.constant 0 : i32
    %c0_i32_0 = arith.constant 0 : i32
    return %arg0, %c0_i32 : i32, i32
  }
}

</mosaic_0001>

<bundles_post_ra>
// kernel: tpu_custom_call.1
= control target key start
LH: loop header
LB: loop body
LE: loop exit
PB: predicated region body
PF: predicated region fallthrough
CT: control target
= control target key end

     0   :  { %10 = vsyncpa [#allocation3], 0  ;;  %s479_s0 = inlined_call_operand.hbm [shape: f32[2,32], index: 0, kind: input, shape index: {}]   ;;  %s480_s1 = inlined_call_operand.hbm [shape: bf16[32,64], index: 1, kind: input, shape index: {}]   ;;  %s481_s2 = inlined_call_operand.vmem [shape: f32[1,64], index: 2, kind: input, shape index: {}]   ;;  %s482_s3 = inlined_call_operand.hbm [shape: bf16[64,128], index: 3, kind: input, shape index: {}]   ;;  %s483_s4 = inlined_call_operand.vmem [shape: f32[1,128], index: 4, kind: input, shape index: {}]   ;;  %s484_s5 = inlined_call_operand.hbm [shape: f32[2,128], index: 5, kind: output, shape index: {}]  }
   0x1   :  { %11 = vsyncpa [#allocation6], 0 }
   0x2   :  { %12 = vsyncpa [#allocation4], 0  ;;  %s381_s18 = smov [#allocation5]   ;;  %s287_s22 = scalar_lea.hbm %s480_s1, 256 }
   0x3   :  { %s28_s19 = sshll.u32 %s381_s18, 4  ;;  %p288_p0 = scmp.ne.s32.totalorder %s480_s1, %s287_s22  ;;  %s29_s19 = int_to_ptr.vmem [resolvable:$true] %s28_s19 }
   0x4   :  { %p291_p1 = scmp.lt.u32.totalorder %s287_s22, %s480_s1 }
   0x6   :  { %p293_p2 = pnand %p291_p1, %p288_p0 }
   0x8   :  { %296 = shalt.err (!%p293_p2)
}
   0x9   :  { %s297_s27 = scalar_lea.vmem %s29_s19, 256  ;;  %p302_p4 = scmp.lt.s32.totalorder %s29_s19, %s29_s19 }
   0xa   :  { %p298_p3 = scmp.ne.s32.totalorder %s29_s19, %s297_s27  ;;  %p303_p5 = scmp.lt.s32.totalorder %s297_s27, %s297_s27 }
   0xc   :  { %p304_p6 = por %p303_p5, %p302_p4 }
   0xe   :  { %p305_p7 = pnand %p304_p6, %p298_p3 }
  0x10   :  { %308 = shalt.err (!%p305_p7)
}
  0x11   :  { %s382_s28 = smov 64   ;;  %s383_s29 = smov 4  }
  0x12   :  { %34 = dma.hbm_to_vmem [thread:$0]  %s480_s1, 256, %s29_s19, [#allocation6], %s382_s28, %s382_s28, %s383_s29  }
  0x13   :  { %s384_s7 = smov [#allocation2]   ;;  %s385_s9 = smov [#allocation7]  }
  0x14   :  { %s19_s8 = sshll.u32 %s384_s7, 4  ;;  %s42_s10 = sshll.u32 %s385_s9, 4  ;;  %s20_s8 = int_to_ptr.vmem [resolvable:$true] %s19_s8  ;;  %s43_s10 = int_to_ptr.vmem [resolvable:$true] %s42_s10 }
  0x15   :  { %s309_s13 = scalar_lea.hbm %s479_s0, 32 }
  0x16   :  { %p310_p8 = scmp.ne.s32.totalorder %s479_s0, %s309_s13  ;;  %p313_p9 = scmp.lt.u32.totalorder %s309_s13, %s479_s0 }
  0x18   :  { %p315_p10 = pnand %p313_p9, %p310_p8 }
  0x1a   :  { %318 = shalt.err (!%p315_p10)
}
  0x1b   :  { %s319_s1 = scalar_lea.vmem %s20_s8, 32  ;;  %p324_p12 = scmp.lt.s32.totalorder %s20_s8, %s20_s8 }
  0x1c   :  { %p320_p11 = scmp.ne.s32.totalorder %s20_s8, %s319_s1  ;;  %p325_p13 = scmp.lt.s32.totalorder %s319_s1, %s319_s1 }
  0x1e   :  { %p326_p0 = por %p325_p13, %p324_p12 }
  0x20   :  { %p327_p1 = pnand %p326_p0, %p320_p11 }
  0x22   :  { %330 = shalt.err (!%p327_p1)
}
  0x23   :  { %22 = dma.hbm_to_vmem [thread:$0]  %s479_s0, 32, %s20_s8, [#allocation3]  }
  0x24   :  { %s331_s22 = scalar_lea.hbm %s482_s3, 512 }
  0x25   :  { %p332_p2 = scmp.ne.s32.totalorder %s482_s3, %s331_s22  ;;  %p335_p3 = scmp.lt.u32.totalorder %s331_s22, %s482_s3 }
  0x27   :  { %p337_p4 = pnand %p335_p3, %p332_p2 }
  0x29   :  { %340 = shalt.err (!%p337_p4)
}
  0x2a   :  { %s341_s27 = scalar_lea.vmem %s43_s10, 512  ;;  %p346_p6 = scmp.lt.s32.totalorder %s43_s10, %s43_s10 }
  0x2b   :  { %p342_p5 = scmp.ne.s32.totalorder %s43_s10, %s341_s27  ;;  %p347_p7 = scmp.lt.s32.totalorder %s341_s27, %s341_s27 }
  0x2d   :  { %p348_p8 = por %p347_p7, %p346_p6 }
  0x2f   :  { %p349_p9 = pnand %p348_p8, %p342_p5 }
  0x31   :  { %352 = shalt.err (!%p349_p9)
}
  0x32   :  { %48 = dma.hbm_to_vmem [thread:$0]  %s482_s3, 512, %s43_s10, [#allocation6], %s382_s28, %s382_s28, %s383_s29  }
  0x33   :  { %375 = dma.done.wait [#allocation3], 32  }
  0x34   :  { %376 = vsyncadd [#allocation3], 4294967264 }
  0x35   :  { %377 = dma.done.wait [#allocation6], 768  }
  0x36   :  { %378 = vsyncadd [#allocation6], 4294966528  ;;  %v386_v0 = vmov 0.0   ;;  %vm387_vm0 = vmmov 0   ;;  %v281_v1 = vld [vmem:[#allocation5] sm:$0xff]   ;;  %v282_v2 = vld [vmem:[#allocation5 + $0x8] sm:$0xff]  }
  0x37   :  { %253 = vmatprep.subr.bf16.mxu0 %v386_v0  ;;  %257 = vmatprep.mubr.msk.bf16.mxu0 %vm387_vm0, %v386_v0  ;;  %v61_v3 = vld [vmem:[#allocation2] sm:$0x3]  ;;  %v283_v4 = vld [vmem:[#allocation7] sm:$0xff]   ;;  %vm79_vm1 = vcmask 261120   ;;  %v285_v7 = vld [vmem:[#allocation7 + $0x10] sm:$0xff]   ;;  %vm165_vm2 = vcmask 523264  }
  0x38   :  { %261 = vmatprep.subr.bf16.mxu1 %v386_v0  ;;  %269 = vmatprep.mubr.msk.bf16.mxu1 %vm387_vm0, %v386_v0  ;;  %v62_v5 = vpack.c.bf16 %v61_v3, %v61_v3  ;;  %v284_v6 = vld [vmem:[#allocation7 + $0x8] sm:$0xff]   ;;  %v286_v8 = vld [vmem:[#allocation7 + $0x18] sm:$0xff]   ;;  %s388_s7 = smov [#allocation8]  }
  0x39   :  { %254 = vmatpush3.bf16.msra.mxu0 %v281_v1  ;;  %262 = vmatpush3.bf16.msra.mxu1 %v283_v4  ;;  %v238_v10 = vld [vmem:[%s481_s2] ss:$0 sm:$0xff]  ;;  %s225_s8 = sshll.u32 %s388_s7, 4  ;;  %s226_s8 = int_to_ptr.vmem [resolvable:$true] %s225_s8 }
  0x3a   :  { %255 = vmatprep.subr.bf16.mxu0 %v386_v0  ;;  %263 = vmatprep.subr.bf16.mxu1 %v386_v0  ;;  %v244_v18 = vld [vmem:[%s483_s4] ss:$0 sm:$0xff]  ;;  %s353_s2 = scalar_lea.vmem %s226_s8, 32  ;;  %p358_p11 = scmp.lt.s32.totalorder %s226_s8, %s226_s8 }
  0x3b   :  { %p354_p10 = scmp.ne.s32.totalorder %s226_s8, %s353_s2  ;;  %p359_p12 = scmp.lt.s32.totalorder %s353_s2, %s353_s2 }
  0x3d   :  { %256 = vmatpush3.bf16.msra.mxu0 %v282_v2  ;;  %264 = vmatpush3.bf16.msra.mxu1 %v284_v6  ;;  %p360_p13 = por %p359_p12, %p358_p11 }
  0x3e   :  { %265 = vmatprep.subr.bf16.mxu1 %v386_v0 }
  0x3f   :  { %p361_p0 = pnand %p360_p13, %p354_p10 }
  0x40   :  { %258 = vmatmul.mubr.msk.bf16.vlgmr.msra.gmra.mrb[0].mxu0 %vm79_vm1, %v62_v5 }
  0x41   :  { %266 = vmatpush3.bf16.msra.mxu1 %v285_v7 }
  0x42   :  { %267 = vmatprep.subr.bf16.mxu1 %v386_v0 }
  0x45   :  { %268 = vmatpush3.bf16.msra.mxu1 %v286_v8 }
 0x113   :  { %v117_v9 = vpop.f32.mrb[0].mxu0 }
 0x114   :  { %v123_v11 = vmul.f32 0.17677669, %v117_v9  ;;  %v259_v12 = vpop.f32.mrb[1].mxu0 }
 0x115   :  { %v120_v13 = vpop.f32.mrb[2].mxu0 }
 0x116   :  { %v131_v14 = vadd.f32 %v238_v10, %v123_v11  ;;  %v260_v15 = vpop.f32.mrb[3].mxu0 }
 0x118   :  { %v132_v16 = vpack.c.bf16 %v131_v14, %v131_v14 }
 0x11a   :  { %270 = vmatmul.mubr.msk.bf16.vlgmr.msra.gmra.mrb[0].mxu1 %vm165_vm2, %v132_v16 }
 0x1ed   :  { %v203_v17 = vpop.f32.mrb[0].mxu1 }
 0x1ee   :  { %v209_v19 = vmul.f32 0.125, %v203_v17  ;;  %v271_v20 = vpop.f32.mrb[1].mxu1 }
 0x1ef   :  { %v206_v21 = vpop.f32.mrb[2].mxu1 }
 0x1f0   :  { %v217_v22 = vadd.f32 %v244_v18, %v209_v19  ;;  %v272_v23 = vpop.f32.mrb[3].mxu1 }
 0x1f2   :  { %218 = vst [vmem:[#allocation8] sm:$0x3] %v217_v22 }
 0x1f3   :  { %364 = shalt.err (!%p361_p0)
}
 0x1f4   :  { %s365_s4 = scalar_lea.hbm %s484_s5, 32 }
 0x1f5   :  { %p366_p1 = scmp.ne.s32.totalorder %s484_s5, %s365_s4  ;;  %p369_p2 = scmp.lt.u32.totalorder %s365_s4, %s484_s5 }
 0x1f7   :  { %p371_p3 = pnand %p369_p2, %p366_p1 }
 0x1f9   :  { %374 = shalt.err (!%p371_p3)
}
 0x1fa   :  { %228 = dma.vmem_to_hbm [thread:$0]  %s226_s8, 32, %s484_s5, [#allocation4]  }
 0x1fb   :  { %379 = dma.done.wait [#allocation4], 32  }
 0x1fc   :  { %380 = vsyncadd [#allocation4], 4294967264 }
 0x1fd   :  { %232 = vsyncpa [#allocation3], 1 }
 0x1fe   :  { %233 = vsyncpa [#allocation6], 1 }
 0x1ff   :  { %234 = vsyncpa [#allocation4], 1 }

// kernel: tpu_custom_call.1
= control target key start
LH: loop header
LB: loop body
LE: loop exit
PB: predicated region body
PF: predicated region fallthrough
CT: control target
= control target key end

     0   :  { %10 = vsyncpa [#allocation3], 0  ;;  %s479_s0 = inlined_call_operand.hbm [shape: f32[2,32], index: 0, kind: input, shape index: {}]   ;;  %s480_s1 = inlined_call_operand.hbm [shape: bf16[32,64], index: 1, kind: input, shape index: {}]   ;;  %s481_s2 = inlined_call_operand.vmem [shape: f32[1,64], index: 2, kind: input, shape index: {}]   ;;  %s482_s3 = inlined_call_operand.hbm [shape: bf16[64,128], index: 3, kind: input, shape index: {}]   ;;  %s483_s4 = inlined_call_operand.vmem [shape: f32[1,128], index: 4, kind: input, shape index: {}]   ;;  %s484_s5 = inlined_call_operand.hbm [shape: f32[2,128], index: 5, kind: output, shape index: {}]  }
   0x1   :  { %11 = vsyncpa [#allocation6], 0 }
   0x2   :  { %12 = vsyncpa [#allocation4], 0  ;;  %s381_s18 = smov [#allocation5]   ;;  %s287_s22 = scalar_lea.hbm %s480_s1, 256 }
   0x3   :  { %s28_s19 = sshll.u32 %s381_s18, 4  ;;  %p288_p0 = scmp.ne.s32.totalorder %s480_s1, %s287_s22  ;;  %s29_s19 = int_to_ptr.vmem [resolvable:$true] %s28_s19 }
   0x4   :  { %p291_p1 = scmp.lt.u32.totalorder %s287_s22, %s480_s1 }
   0x6   :  { %p293_p2 = pnand %p291_p1, %p288_p0 }
   0x8   :  { %296 = shalt.err (!%p293_p2)
}
   0x9   :  { %s297_s27 = scalar_lea.vmem %s29_s19, 256  ;;  %p302_p4 = scmp.lt.s32.totalorder %s29_s19, %s29_s19 }
   0xa   :  { %p298_p3 = scmp.ne.s32.totalorder %s29_s19, %s297_s27  ;;  %p303_p5 = scmp.lt.s32.totalorder %s297_s27, %s297_s27 }
   0xc   :  { %p304_p6 = por %p303_p5, %p302_p4 }
   0xe   :  { %p305_p7 = pnand %p304_p6, %p298_p3 }
  0x10   :  { %308 = shalt.err (!%p305_p7)
}
  0x11   :  { %s382_s28 = smov 64   ;;  %s383_s29 = smov 4  }
  0x12   :  { %34 = dma.hbm_to_vmem [thread:$0]  %s480_s1, 256, %s29_s19, [#allocation6], %s382_s28, %s382_s28, %s383_s29  }
  0x13   :  { %s384_s7 = smov [#allocation2]   ;;  %s385_s9 = smov [#allocation7]  }
  0x14   :  { %s19_s8 = sshll.u32 %s384_s7, 4  ;;  %s42_s10 = sshll.u32 %s385_s9, 4  ;;  %s20_s8 = int_to_ptr.vmem [resolvable:$true] %s19_s8  ;;  %s43_s10 = int_to_ptr.vmem [resolvable:$true] %s42_s10 }
  0x15   :  { %s309_s13 = scalar_lea.hbm %s479_s0, 32 }
  0x16   :  { %p310_p8 = scmp.ne.s32.totalorder %s479_s0, %s309_s13  ;;  %p313_p9 = scmp.lt.u32.totalorder %s309_s13, %s479_s0 }
  0x18   :  { %p315_p10 = pnand %p313_p9, %p310_p8 }
  0x1a   :  { %318 = shalt.err (!%p315_p10)
}
  0x1b   :  { %s319_s1 = scalar_lea.vmem %s20_s8, 32  ;;  %p324_p12 = scmp.lt.s32.totalorder %s20_s8, %s20_s8 }
  0x1c   :  { %p320_p11 = scmp.ne.s32.totalorder %s20_s8, %s319_s1  ;;  %p325_p13 = scmp.lt.s32.totalorder %s319_s1, %s319_s1 }
  0x1e   :  { %p326_p0 = por %p325_p13, %p324_p12 }
  0x20   :  { %p327_p1 = pnand %p326_p0, %p320_p11 }
  0x22   :  { %330 = shalt.err (!%p327_p1)
}
  0x23   :  { %22 = dma.hbm_to_vmem [thread:$0]  %s479_s0, 32, %s20_s8, [#allocation3]  }
  0x24   :  { %s331_s22 = scalar_lea.hbm %s482_s3, 512 }
  0x25   :  { %p332_p2 = scmp.ne.s32.totalorder %s482_s3, %s331_s22  ;;  %p335_p3 = scmp.lt.u32.totalorder %s331_s22, %s482_s3 }
  0x27   :  { %p337_p4 = pnand %p335_p3, %p332_p2 }
  0x29   :  { %340 = shalt.err (!%p337_p4)
}
  0x2a   :  { %s341_s27 = scalar_lea.vmem %s43_s10, 512  ;;  %p346_p6 = scmp.lt.s32.totalorder %s43_s10, %s43_s10 }
  0x2b   :  { %p342_p5 = scmp.ne.s32.totalorder %s43_s10, %s341_s27  ;;  %p347_p7 = scmp.lt.s32.totalorder %s341_s27, %s341_s27 }
  0x2d   :  { %p348_p8 = por %p347_p7, %p346_p6 }
  0x2f   :  { %p349_p9 = pnand %p348_p8, %p342_p5 }
  0x31   :  { %352 = shalt.err (!%p349_p9)
}
  0x32   :  { %48 = dma.hbm_to_vmem [thread:$0]  %s482_s3, 512, %s43_s10, [#allocation6], %s382_s28, %s382_s28, %s383_s29  }
  0x33   :  { %375 = dma.done.wait [#allocation3], 32  }
  0x34   :  { %376 = vsyncadd [#allocation3], 4294967264 }
  0x35   :  { %377 = dma.done.wait [#allocation6], 768  }
  0x36   :  { %378 = vsyncadd [#allocation6], 4294966528  ;;  %v386_v0 = vmov 0.0   ;;  %vm387_vm0 = vmmov 0   ;;  %v281_v1 = vld [vmem:[#allocation5] sm:$0xff]   ;;  %v282_v2 = vld [vmem:[#allocation5 + $0x8] sm:$0xff]  }
  0x37   :  { %253 = vmatprep.subr.bf16.mxu0 %v386_v0  ;;  %257 = vmatprep.mubr.msk.bf16.mxu0 %vm387_vm0, %v386_v0  ;;  %v61_v3 = vld [vmem:[#allocation2] sm:$0x3]  ;;  %v283_v4 = vld [vmem:[#allocation7] sm:$0xff]   ;;  %vm79_vm1 = vcmask 261120   ;;  %v285_v7 = vld [vmem:[#allocation7 + $0x10] sm:$0xff]   ;;  %vm165_vm2 = vcmask 523264  }
  0x38   :  { %261 = vmatprep.subr.bf16.mxu1 %v386_v0  ;;  %269 = vmatprep.mubr.msk.bf16.mxu1 %vm387_vm0, %v386_v0  ;;  %v62_v5 = vpack.c.bf16 %v61_v3, %v61_v3  ;;  %v284_v6 = vld [vmem:[#allocation7 + $0x8] sm:$0xff]   ;;  %v286_v8 = vld [vmem:[#allocation7 + $0x18] sm:$0xff]   ;;  %s388_s7 = smov [#allocation8]  }
  0x39   :  { %254 = vmatpush3.bf16.msra.mxu0 %v281_v1  ;;  %262 = vmatpush3.bf16.msra.mxu1 %v283_v4  ;;  %v238_v10 = vld [vmem:[%s481_s2] ss:$0 sm:$0xff]  ;;  %s225_s8 = sshll.u32 %s388_s7, 4  ;;  %s226_s8 = int_to_ptr.vmem [resolvable:$true] %s225_s8 }
  0x3a   :  { %255 = vmatprep.subr.bf16.mxu0 %v386_v0  ;;  %263 = vmatprep.subr.bf16.mxu1 %v386_v0  ;;  %v244_v18 = vld [vmem:[%s483_s4] ss:$0 sm:$0xff]  ;;  %s353_s2 = scalar_lea.vmem %s226_s8, 32  ;;  %p358_p11 = scmp.lt.s32.totalorder %s226_s8, %s226_s8 }
  0x3b   :  { %p354_p10 = scmp.ne.s32.totalorder %s226_s8, %s353_s2  ;;  %p359_p12 = scmp.lt.s32.totalorder %s353_s2, %s353_s2 }
  0x3d   :  { %256 = vmatpush3.bf16.msra.mxu0 %v282_v2  ;;  %264 = vmatpush3.bf16.msra.mxu1 %v284_v6  ;;  %p360_p13 = por %p359_p12, %p358_p11 }
  0x3e   :  { %265 = vmatprep.subr.bf16.mxu1 %v386_v0 }
  0x3f   :  { %p361_p0 = pnand %p360_p13, %p354_p10 }
  0x40   :  { %258 = vmatmul.mubr.msk.bf16.vlgmr.msra.gmra.mrb[0].mxu0 %vm79_vm1, %v62_v5 }
  0x41   :  { %266 = vmatpush3.bf16.msra.mxu1 %v285_v7 }
  0x42   :  { %267 = vmatprep.subr.bf16.mxu1 %v386_v0 }
  0x45   :  { %268 = vmatpush3.bf16.msra.mxu1 %v286_v8 }
 0x113   :  { %v117_v9 = vpop.f32.mrb[0].mxu0 }
 0x114   :  { %v123_v11 = vmul.f32 0.17677669, %v117_v9  ;;  %v259_v12 = vpop.f32.mrb[1].mxu0 }
 0x115   :  { %v120_v13 = vpop.f32.mrb[2].mxu0 }
 0x116   :  { %v131_v14 = vadd.f32 %v238_v10, %v123_v11  ;;  %v260_v15 = vpop.f32.mrb[3].mxu0 }
 0x118   :  { %v132_v16 = vpack.c.bf16 %v131_v14, %v131_v14 }
 0x11a   :  { %270 = vmatmul.mubr.msk.bf16.vlgmr.msra.gmra.mrb[0].mxu1 %vm165_vm2, %v132_v16 }
 0x1ed   :  { %v203_v17 = vpop.f32.mrb[0].mxu1 }
 0x1ee   :  { %v209_v19 = vmul.f32 0.125, %v203_v17  ;;  %v271_v20 = vpop.f32.mrb[1].mxu1 }
 0x1ef   :  { %v206_v21 = vpop.f32.mrb[2].mxu1 }
 0x1f0   :  { %v217_v22 = vadd.f32 %v244_v18, %v209_v19  ;;  %v272_v23 = vpop.f32.mrb[3].mxu1 }
 0x1f2   :  { %218 = vst [vmem:[#allocation8] sm:$0x3] %v217_v22 }
 0x1f3   :  { %364 = shalt.err (!%p361_p0)
}
 0x1f4   :  { %s365_s4 = scalar_lea.hbm %s484_s5, 32 }
 0x1f5   :  { %p366_p1 = scmp.ne.s32.totalorder %s484_s5, %s365_s4  ;;  %p369_p2 = scmp.lt.u32.totalorder %s365_s4, %s484_s5 }
 0x1f7   :  { %p371_p3 = pnand %p369_p2, %p366_p1 }
 0x1f9   :  { %374 = shalt.err (!%p371_p3)
}
 0x1fa   :  { %228 = dma.vmem_to_hbm [thread:$0]  %s226_s8, 32, %s484_s5, [#allocation4]  }
 0x1fb   :  { %379 = dma.done.wait [#allocation4], 32  }
 0x1fc   :  { %380 = vsyncadd [#allocation4], 4294967264 }
 0x1fd   :  { %232 = vsyncpa [#allocation3], 1 }
 0x1fe   :  { %233 = vsyncpa [#allocation6], 1 }
 0x1ff   :  { %234 = vsyncpa [#allocation4], 1 }

</bundles_post_ra>
